<compile_context>
chip_gen: v7x
topology: tpu7x:2x2x1
jax: 0.10.0
libtpu: 0.0.40
codegen_flags: <defaults>
</compile_context>

<pallas_src>
import functools

import jax
import jax.numpy as jnp
from jax.experimental import pallas as pl
from jax.experimental.pallas import tpu as pltpu

_VMEM_LIMIT_BYTES = 48 * 1024 * 1024


def _gamma_parts(gamma):
    g = float(gamma)
    gi = int(g) if (g >= 0.0 and g == int(g)) else None
    return g, gi


def _pow_gamma(omp, gamma, gamma_int):
    """(1 - pt) ** gamma; unrolled multiplies for integral gamma (no log/exp)."""
    if gamma_int is not None:
        if gamma_int == 0:
            return jnp.ones_like(omp)
        w = omp
        for _ in range(gamma_int - 1):
            w = w * omp
        return w
    return jnp.where(omp > 0.0, omp ** jnp.float32(gamma), jnp.float32(0.0))


# ----------------------------------------------------------------------------
# Fast path: num_class == 2, N % 64 == 0.
# ----------------------------------------------------------------------------
def _focal_c2_kernel(alpha_ref, x_ref, sel_ref, out_ref, *,
                     gamma, gamma_int, rows_total, tile_rows):
    i = pl.program_id(0)

    x = x_ref[...].astype(jnp.float32)                       # (TR, 128) interleaved
    lane = jax.lax.broadcasted_iota(jnp.int32, x.shape, 1)   # lane index
    even = (lane & 1) == 0                                   # class-0 lanes

    # Partner logit of each (sample, class) lane: lanes (2k, 2k+1) hold one
    # sample's (class0, class1).  roll(x, 127) == x[lane+1], roll(x, 1) == x[lane-1].
    nbr_hi = pltpu.roll(x, 127, 1)
    nbr_lo = pltpu.roll(x, 1, 1)
    x_other = jnp.where(even, nbr_hi, nbr_lo)
    m = x - x_other                                          # margin for "this" class

    # Stable binary log-softmax / sigmoid: logpt = log sigmoid(m), omp = 1 - pt.
    e = jnp.exp(-jnp.abs(m))                                 # <= 1, never overflows
    denom = 1.0 + e
    logpt = jnp.minimum(m, 0.0) - jnp.log(denom)
    omp = jnp.where(m >= 0.0, e, 1.0) / denom                # = sigmoid(-m) in [0, 1]

    w = _pow_gamma(omp, gamma, gamma_int)

    a0 = alpha_ref[0]                                        # SMEM scalars
    a1 = alpha_ref[1]
    alpha_lane = jnp.where(even, a0, a1)
    focal = -(alpha_lane * w) * logpt                        # per (sample, class) lane

    # Keep only the target-class lane of each sample, and mask rows past the
    # true data in the (possibly partial) last block -- mask BEFORE reducing.
    row = jax.lax.broadcasted_iota(jnp.int32, x.shape, 0) + i * tile_rows
    valid = (sel_ref[...] != 0) & (row < rows_total)
    contrib = jnp.where(valid, focal, 0.0)

    out_ref[...] = jnp.sum(contrib, axis=0, keepdims=True).reshape(1, 1, 128)


def _focal_loss_c2(logit, target, alpha, gamma, tile_rows):
    n, c = logit.shape
    rows = (n * 2) // 128

    if tile_rows is None:
        tile_rows = 4096                       # ~2 MiB of f32 logits per step
    if rows <= tile_rows:
        tile_rows = rows
        num_blocks = 1
    else:
        tile_rows = max(32, (int(tile_rows) // 32) * 32)   # 32 -> legal f32/bf16/int8 blocks
        num_blocks = pl.cdiv(rows, tile_rows)

    x = logit.reshape(rows, 128)               # free row-major view, no transpose/pad
    tgt = target.reshape(n, 1).astype(jnp.int32)
    sel = (tgt == jnp.arange(2, dtype=jnp.int32)[None, :]).astype(jnp.int8)
    sel = sel.reshape(rows, 128)               # free view, matches logits interleave
    a = alpha.astype(jnp.float32).reshape(2)

    gamma_f, gamma_int = _gamma_parts(gamma)
    kernel = functools.partial(
        _focal_c2_kernel, gamma=gamma_f, gamma_int=gamma_int,
        rows_total=rows, tile_rows=tile_rows)

    partials = pl.pallas_call(
        kernel,
        out_shape=jax.ShapeDtypeStruct((num_blocks, 1, 128), jnp.float32),
        grid=(num_blocks,),
        in_specs=[
            pl.BlockSpec(memory_space=pltpu.MemorySpace.SMEM),   # alpha scalars
            pl.BlockSpec((tile_rows, 128), lambda i: (i, 0)),    # interleaved logits
            pl.BlockSpec((tile_rows, 128), lambda i: (i, 0)),    # int8 one-hot
        ],
        out_specs=pl.BlockSpec((1, 1, 128), lambda i: (i, 0, 0)),  # per-step partials
        compiler_params=pltpu.CompilerParams(
            dimension_semantics=("parallel",),                    # megacore-safe
            vmem_limit_bytes=_VMEM_LIMIT_BYTES),
    )(a, x, sel)

    return jnp.sum(partials) / jnp.float32(n)


# ----------------------------------------------------------------------------
# General path: any num_class, any N (correctness fallback).
# ----------------------------------------------------------------------------
def _focal_general_kernel(logit_ref, target_ref, alpha_ref, out_ref, *,
                          gamma, gamma_int, n_valid, tile_n):
    i = pl.program_id(0)

    x = logit_ref[...].astype(jnp.float32)     # (C, TN) logits, classes on sublanes
    t = target_ref[...]                        # (1, TN) int32 class indices
    a = alpha_ref[...].astype(jnp.float32)     # (C, 1)  per-class alpha

    mx = jnp.max(x, axis=0, keepdims=True)
    z = x - mx
    lse = jnp.log(jnp.sum(jnp.exp(z), axis=0, keepdims=True))
    logp = z - lse

    cls = jax.lax.broadcasted_iota(jnp.int32, x.shape, 0)
    onehot = (cls == t).astype(jnp.float32)
    logpt = jnp.sum(logp * onehot, axis=0, keepdims=True)
    alpha_t = jnp.sum(a * onehot, axis=0, keepdims=True)

    pt = jnp.exp(logpt)
    omp = jnp.maximum(1.0 - pt, 0.0)
    w = _pow_gamma(omp, gamma, gamma_int)
    focal = -(alpha_t * w) * logpt

    # Mask garbage lanes of the partial last tile before any reduction.
    lane = jax.lax.broadcasted_iota(jnp.int32, focal.shape, 1)
    valid = (i * tile_n + lane) < n_valid
    tile_sum = jnp.sum(jnp.where(valid, focal, jnp.float32(0.0)))

    @pl.when(i == 0)
    def _():
        out_ref[...] = jnp.zeros_like(out_ref)

    out_ref[...] += jnp.reshape(tile_sum, (1, 1))

    @pl.when(i == pl.num_programs(0) - 1)
    def _():
        out_ref[...] = out_ref[...] / jnp.float32(n_valid)


def _focal_loss_general(logit, target, alpha, gamma, tile_n):
    n, c = logit.shape
    itemsize = jnp.dtype(logit.dtype).itemsize
    if tile_n is None:
        budget = 1 * 1024 * 1024
        tile_n = max(128, (budget // max(1, c * itemsize)) // 128 * 128)
    else:
        tile_n = max(128, (int(tile_n) // 128) * 128)
    if n <= tile_n:
        tile_n = n                 # single full block (any width is legal)
        num_tiles = 1
    else:
        num_tiles = pl.cdiv(n, tile_n)   # partial edge block handled in-kernel

    # TODO(synk): fallback path still pays one XLA transpose of logits; the
    # C == 2 / N % 64 == 0 fast path above avoids it entirely.
    x = jnp.transpose(logit, (1, 0))
    t = target.reshape(1, n).astype(jnp.int32)
    a = alpha.astype(jnp.float32).reshape(c, 1)

    gamma_f, gamma_int = _gamma_parts(gamma)
    kernel = functools.partial(
        _focal_general_kernel, gamma=gamma_f, gamma_int=gamma_int,
        n_valid=n, tile_n=tile_n)

    out = pl.pallas_call(
        kernel,
        out_shape=jax.ShapeDtypeStruct((1, 1), jnp.float32),
        grid=(num_tiles,),
        in_specs=[
            pl.BlockSpec((c, tile_n), lambda i: (0, i)),
            pl.BlockSpec((1, tile_n), lambda i: (0, i)),
            pl.BlockSpec((c, 1), lambda i: (0, 0)),
        ],
        out_specs=pl.BlockSpec((1, 1), lambda i: (0, 0)),   # resident accumulator
        compiler_params=pltpu.CompilerParams(
            dimension_semantics=("arbitrary",),
            vmem_limit_bytes=_VMEM_LIMIT_BYTES),
    )(x, t, a)
    return out[0, 0]


# ----------------------------------------------------------------------------
# Public entry point: FocalLoss_v2.forward(logit, target) -> scalar mean.
# ----------------------------------------------------------------------------
def focal_loss_v2(logit, target, alpha=None, gamma=2.0, tile_rows=None, tile_n=None):
    n, c = logit.shape
    target = target.reshape(-1)
    if alpha is None:
        alpha = jnp.ones((c,), dtype=jnp.float32)   # module default
    if c == 2 and n >= 64 and n % 64 == 0:
        return _focal_loss_c2(logit, target, alpha, gamma, tile_rows)
    return _focal_loss_general(logit, target, alpha, gamma, tile_n)


def _reference(logit, target, alpha, gamma):
    logp = jax.nn.log_softmax(logit.astype(jnp.float32), axis=-1)
    logpt = jnp.take_along_axis(logp, target[:, None].astype(jnp.int32), axis=-1)[:, 0]
    pt = jnp.exp(logpt)
    return jnp.mean(-(alpha[target] * (1.0 - pt) ** gamma) * logpt)


if __name__ == "__main__":
    base_key = jax.random.PRNGKey(0)

    def check(batch, num_class, gamma, alpha=None, tile_rows=None, tile_n=None, salt=0):
        kl, kt = jax.random.split(jax.random.fold_in(base_key, salt))
        logit = jax.random.normal(kl, (batch, num_class), dtype=jnp.float32)
        target = jax.random.randint(kt, (batch,), 0, num_class, dtype=jnp.int32)
        alpha_arr = (jnp.ones((num_class,), jnp.float32) if alpha is None
                     else jnp.asarray(alpha, jnp.float32))
        loss = focal_loss_v2(logit, target, alpha_arr, gamma=gamma,
                             tile_rows=tile_rows, tile_n=tile_n)
        jax.block_until_ready(loss)
        ref = _reference(logit, target, alpha_arr, gamma)
        assert jnp.allclose(loss, ref, atol=1e-5, rtol=1e-4), (
            batch, num_class, float(loss), float(ref))

    # 1) module defaults (num_class=2, gamma=2, alpha=ones), tiny batch -> general path.
    check(8, 2, 2.0)
    # 2) C=2 fast path, single block, non-uniform alpha.
    check(256, 2, 2.0, alpha=[0.25, 0.75])
    # 3) C=2 fast path, several row-blocks + masked partial last block.
    check(4608, 2, 2.0, tile_rows=32, salt=1)
    # 4) general path, multiple lane tiles + masked partial last tile.
    check(300, 2, 2.0, tile_n=128, salt=2)
    # 5) general path: num_class=3, non-integral gamma, non-uniform alpha.
    check(77, 3, 1.5, alpha=[0.2, 0.3, 0.5], salt=3)

    print("KERNEL_OK")
</pallas_src>

<mosaic_0001>
module attributes {stable_mosaic.version = 11 : i64} {
  func.func @_focal_general_kernel(%arg0: i32, %arg1: memref<2x8xf32, #tpu.memory_space<vmem>>, %arg2: memref<1x8xi32, #tpu.memory_space<vmem>>, %arg3: memref<2x1xf32, #tpu.memory_space<vmem>>, %arg4: memref<1x1xf32, #tpu.memory_space<vmem>>) attributes {dimension_semantics = [#tpu.dimension_semantics<arbitrary>], iteration_bounds = array<i64: 1>, scalar_prefetch = 0 : i64, scratch_operands = 0 : i64, tpu.core_type = #tpu.core_type<tc>, window_params = [{transform_indices = @transform_0, window_bounds = array<i64: 2, 8>}, {transform_indices = @transform_1, window_bounds = array<i64: 1, 8>}, {pipeline_mode = #tpu.pipeline_mode<synchronous>, transform_indices = @transform_2, window_bounds = array<i64: 2, 1>}, {pipeline_mode = #tpu.pipeline_mode<synchronous>, transform_indices = @transform_3, window_bounds = array<i64: 1, 1>}]} {
    %c0 = arith.constant 0 : index
    %c0_0 = arith.constant 0 : index
    %0 = vector.load %arg1[%c0, %c0_0] : memref<2x8xf32, #tpu.memory_space<vmem>>, vector<2x8xf32>
    %c0_1 = arith.constant 0 : index
    %c0_2 = arith.constant 0 : index
    %1 = vector.load %arg2[%c0_1, %c0_2] : memref<1x8xi32, #tpu.memory_space<vmem>>, vector<1x8xi32>
    %c0_3 = arith.constant 0 : index
    %c0_4 = arith.constant 0 : index
    %2 = vector.load %arg3[%c0_3, %c0_4] : memref<2x1xf32, #tpu.memory_space<vmem>>, vector<2x1xf32>
    %cst = arith.constant dense<0xFF800000> : vector<8xf32>
    %3 = vector.multi_reduction <maximumf>, %0, %cst [0] : vector<2x8xf32> to vector<8xf32>
    %4 = vector.shape_cast %3 : vector<8xf32> to vector<1x8xf32>
    %5 = vector.broadcast %4 : vector<1x8xf32> to vector<2x8xf32>
    %6 = arith.subf %0, %5 : vector<2x8xf32>
    %7 = math.exp %6 : vector<2x8xf32>
    %cst_5 = arith.constant dense<0.000000e+00> : vector<8xf32>
    %8 = vector.multi_reduction <add>, %7, %cst_5 [0] : vector<2x8xf32> to vector<8xf32>
    %9 = vector.shape_cast %8 : vector<8xf32> to vector<1x8xf32>
    %10 = math.log %9 : vector<1x8xf32>
    %11 = vector.broadcast %10 : vector<1x8xf32> to vector<2x8xf32>
    %12 = arith.subf %6, %11 : vector<2x8xf32>
    %13 = tpu.iota {dimensions = array<i32: 0>} : vector<2x8xi32>
    %14 = vector.broadcast %1 : vector<1x8xi32> to vector<2x8xi32>
    %15 = arith.cmpi eq, %13, %14 : vector<2x8xi32>
    %16 = arith.extui %15 : vector<2x8xi1> to vector<2x8xi32>
    %17 = arith.sitofp %16 : vector<2x8xi32> to vector<2x8xf32>
    %18 = arith.mulf %12, %17 : vector<2x8xf32>
    %cst_6 = arith.constant dense<0.000000e+00> : vector<8xf32>
    %19 = vector.multi_reduction <add>, %18, %cst_6 [0] : vector<2x8xf32> to vector<8xf32>
    %20 = vector.shape_cast %19 : vector<8xf32> to vector<1x8xf32>
    %21 = vector.broadcast %2 : vector<2x1xf32> to vector<2x8xf32>
    %22 = arith.mulf %21, %17 : vector<2x8xf32>
    %cst_7 = arith.constant dense<0.000000e+00> : vector<8xf32>
    %23 = vector.multi_reduction <add>, %22, %cst_7 [0] : vector<2x8xf32> to vector<8xf32>
    %24 = vector.shape_cast %23 : vector<8xf32> to vector<1x8xf32>
    %25 = math.exp %20 : vector<1x8xf32>
    %cst_8 = arith.constant 1.000000e+00 : f32
    %26 = vector.broadcast %cst_8 : f32 to vector<1x8xf32>
    %27 = arith.subf %26, %25 : vector<1x8xf32>
    %cst_9 = arith.constant 0.000000e+00 : f32
    %28 = vector.broadcast %cst_9 : f32 to vector<1x8xf32>
    %29 = arith.maximumf %27, %28 : vector<1x8xf32>
    %30 = arith.mulf %29, %29 : vector<1x8xf32>
    %31 = arith.mulf %24, %30 : vector<1x8xf32>
    %cst_10 = arith.constant 0.000000e+00 : f32
    %32 = vector.broadcast %cst_10 : f32 to vector<1x8xf32>
    %33 = arith.subf %32, %31 : vector<1x8xf32>
    %34 = arith.mulf %33, %20 : vector<1x8xf32>
    %35 = tpu.iota {dimensions = array<i32: 1>} : vector<1x8xi32>
    %c8_i32 = arith.constant 8 : i32
    %36 = arith.muli %arg0, %c8_i32 : i32
    %37 = vector.broadcast %36 : i32 to vector<1x8xi32>
    %38 = arith.addi %37, %35 : vector<1x8xi32>
    %c8_i32_11 = arith.constant 8 : i32
    %39 = vector.broadcast %c8_i32_11 : i32 to vector<1x8xi32>
    %40 = arith.cmpi slt, %38, %39 : vector<1x8xi32>
    %cst_12 = arith.constant 0.000000e+00 : f32
    %41 = vector.broadcast %cst_12 : f32 to vector<1x8xf32>
    %42 = arith.select %40, %34, %41 : vector<1x8xi1>, vector<1x8xf32>
    %43 = vector.shape_cast %42 : vector<1x8xf32> to vector<1x1x8xf32>
    %cst_13 = arith.constant dense<0.000000e+00> : vector<1xf32>
    %44 = vector.multi_reduction <add>, %43, %cst_13 [1, 2] : vector<1x1x8xf32> to vector<1xf32>
    %45 = vector.shape_cast %44 : vector<1xf32> to vector<1x1x1xf32>
    %46 = vector.extract %45[0, 0, 0] : f32 from vector<1x1x1xf32>
    %c0_i32 = arith.constant 0 : i32
    %47 = arith.cmpi eq, %arg0, %c0_i32 : i32
    %48 = arith.extui %47 : i1 to i32
    %c0_i32_14 = arith.constant 0 : i32
    %49 = arith.cmpi ne, %48, %c0_i32_14 : i32
    scf.if %49 {
      %cst_21 = arith.constant 0.000000e+00 : f32
      %57 = vector.broadcast %cst_21 : f32 to vector<1x1xf32>
      %c0_22 = arith.constant 0 : index
      %c0_23 = arith.constant 0 : index
      %58 = vector.load %arg4[%c0_22, %c0_23] : memref<1x1xf32, #tpu.memory_space<vmem>>, vector<1x1xf32>
      tpu.vector_store %arg4[%c0_22, %c0_23], %57 {strides = array<i32>} : memref<1x1xf32, #tpu.memory_space<vmem>>, vector<1x1xf32>,
    } else {
    }
    %c0_15 = arith.constant 0 : index
    %c0_16 = arith.constant 0 : index
    %50 = vector.load %arg4[%c0_15, %c0_16] : memref<1x1xf32, #tpu.memory_space<vmem>>, vector<1x1xf32>
    %51 = vector.broadcast %46 : f32 to vector<1x1xf32>
    %52 = arith.addf %50, %51 : vector<1x1xf32>
    %c0_17 = arith.constant 0 : index
    %c0_18 = arith.constant 0 : index
    %53 = vector.load %arg4[%c0_17, %c0_18] : memref<1x1xf32, #tpu.memory_space<vmem>>, vector<1x1xf32>
    tpu.vector_store %arg4[%c0_17, %c0_18], %52 {strides = array<i32>} : memref<1x1xf32, #tpu.memory_space<vmem>>, vector<1x1xf32>,
    %c0_i32_19 = arith.constant 0 : i32
    %54 = arith.cmpi eq, %arg0, %c0_i32_19 : i32
    %55 = arith.extui %54 : i1 to i32
    %c0_i32_20 = arith.constant 0 : i32
    %56 = arith.cmpi ne, %55, %c0_i32_20 : i32
    scf.if %56 {
      %c0_21 = arith.constant 0 : index
      %c0_22 = arith.constant 0 : index
      %57 = vector.load %arg4[%c0_21, %c0_22] : memref<1x1xf32, #tpu.memory_space<vmem>>, vector<1x1xf32>
      %cst_23 = arith.constant 8.000000e+00 : f32
      %58 = vector.broadcast %cst_23 : f32 to vector<1x1xf32>
      %59 = arith.divf %57, %58 : vector<1x1xf32>
      %c0_24 = arith.constant 0 : index
      %c0_25 = arith.constant 0 : index
      %60 = vector.load %arg4[%c0_24, %c0_25] : memref<1x1xf32, #tpu.memory_space<vmem>>, vector<1x1xf32>
      tpu.vector_store %arg4[%c0_24, %c0_25], %59 {strides = array<i32>} : memref<1x1xf32, #tpu.memory_space<vmem>>, vector<1x1xf32>,
    } else {
    }
    return
  }
  func.func @transform_0(%arg0: i32) -> (i32, i32) {
    %c0_i32 = arith.constant 0 : i32
    %c0_i32_0 = arith.constant 0 : i32
    return %c0_i32, %arg0 : i32, i32
  }
  func.func @transform_1(%arg0: i32) -> (i32, i32) {
    %c0_i32 = arith.constant 0 : i32
    %c0_i32_0 = arith.constant 0 : i32
    return %c0_i32, %arg0 : i32, i32
  }
  func.func @transform_2(%arg0: i32) -> (i32, i32) {
    %c0_i32 = arith.constant 0 : i32
    %c0_i32_0 = arith.constant 0 : i32
    %c0_i32_1 = arith.constant 0 : i32
    return %c0_i32, %c0_i32_0 : i32, i32
  }
  func.func @transform_3(%arg0: i32) -> (i32, i32) {
    %c0_i32 = arith.constant 0 : i32
    %c0_i32_0 = arith.constant 0 : i32
    %c0_i32_1 = arith.constant 0 : i32
    return %c0_i32, %c0_i32_0 : i32, i32
  }
}

</mosaic_0001>

<bundles_post_ra>
// kernel: tpu_custom_call.1
= control target key start
LH: loop header
LB: loop body
LE: loop exit
PB: predicated region body
PF: predicated region fallthrough
CT: control target
= control target key end

     0   :  { %vm18_vm0 = vcmask 58368   ;;  %v165_v1 = vmov 0   ;;  %vm99_vm1 = vcmask 0   ;;  %v166_v3 = vmov 0.0   ;;  %s216_s0 = inlined_call_operand.vmem [shape: f32[2,8], index: 0, kind: input, shape index: {}]   ;;  %s217_s1 = inlined_call_operand.vmem [shape: s32[1,8], index: 1, kind: input, shape index: {}]   ;;  %s218_s2 = inlined_call_operand.vmem [shape: f32[2,1], index: 2, kind: input, shape index: {}]   ;;  %s219_s3 = inlined_call_operand.hbm [shape: f32[1,1], index: 3, kind: output, shape index: {}]  }
   0x1   :  { %v17_v0 = vld [vmem:[%s218_s2] sm:$0x3]  ;;  %134 = vset.pattern.permute.xlu0 %v165_v1  ;;  %100 = vst.msk [vmem:[#allocation2] sm:$0x1] %vm99_vm1, %v166_v3 }
   0x2   :  { %v15_v2 = vld [vmem:[%s216_s0] sm:$0x3]  ;;  %58 = vperm.xlu0 %134, %v17_v0  }
   0x3   :  { %v19_v4 = vsel %vm18_vm0, %v15_v2, -inf }
   0x4   :  { %8 = vsyncpa [#allocation3], 0  ;;  %v20_v5 = vrot.slane %v19_v4, 4  ;;  %v39_v21 = vlaneseq  ;;  %v127_v24 = vld [vmem:[%s217_s1] ss:$0 sm:$0xff]  ;;  %vm84_vm4 = vcmask 57344  }
   0x5   :  { %s167_s16 = smov [#allocation2]  }
   0x6   :  { %v21_v6 = vmax.f32 %v19_v4, %v20_v5  ;;  %v40_v23 = vshrl.u32 %v39_v21, 7  ;;  %v78_v50 = vand.u32 127, %v39_v21  ;;  %s119_s17 = sshll.u32 %s167_s16, 4  ;;  %s120_s17 = int_to_ptr.vmem [resolvable:$true] %s119_s17 }
   0x7   :  { %s141_s18 = scalar_lea.vmem %s120_s17, 16  ;;  %s145_s19 = scalar_lea.vmem %s120_s17, 32 }
   0x8   :  { %v22_v7 = vrot.slane %v21_v6, 2  ;;  %vm45_vm2 = vcmp.eq.s32.totalorder %v40_v23, %v127_v24  ;;  %vm82_vm3 = vcmp.lt.s32.totalorder %v78_v50, 8  ;;  %v101_v63 = vld [vmem:[#allocation2] sm:$0x1]  ;;  %p142_p0 = scmp.ne.s32.totalorder %s120_s17, %s141_s18  ;;  %p146_p1 = scmp.lt.s32.totalorder %s120_s17, %s120_s17 }
   0x9   :  { %v128_v27 = vsel %vm45_vm2, 1.0, %v166_v3  ;;  %p147_p2 = scmp.lt.s32.totalorder %s145_s19, %s141_s18 }
   0xa   :  { %v23_v8 = vmax.f32 %v21_v6, %v22_v7 }
   0xb   :  { %p148_p3 = por %p147_p2, %p146_p1 }
   0xc   :  { %v24_v9 = vrot.slane %v23_v8, 1 }
   0xd   :  { %p149_p4 = pnand %p148_p3, %p142_p0 }
   0xe   :  { %v25_v10 = vmax.f32 %v23_v8, %v24_v9 }
  0x10   :  { %v26_v11 = vsub.f32 %v15_v2, %v25_v10 }
  0x12   :  { %v27_v12 = vmul.f32 1.442695, %v26_v11 }
  0x14   :  { %135 = vpow2.f32 %v27_v12 }
  0x1e   :  { %v136_v13 = vpop.eup %135 }
  0x1f   :  { %v29_v14 = vsel %vm18_vm0, %v136_v13, 0.0 }
  0x20   :  { %v30_v15 = vrot.slane %v29_v14, 4 }
  0x22   :  { %v31_v16 = vadd.f32 %v30_v15, %v29_v14 }
  0x24   :  { %v32_v17 = vrot.slane %v31_v16, 2 }
  0x26   :  { %v33_v18 = vadd.f32 %v32_v17, %v31_v16 }
  0x28   :  { %v34_v19 = vrot.slane %v33_v18, 1 }
  0x2a   :  { %v35_v20 = vadd.f32 %v34_v19, %v33_v18 }
  0x2c   :  { %137 = vlog2.f32 %v35_v20 }
  0x36   :  { %v138_v22 = vpop.eup %137 }
  0x37   :  { %v37_v25 = vmul.f32 0.6931472, %v138_v22 }
  0x39   :  { %v38_v26 = vsub.f32 %v26_v11, %v37_v25 }
  0x3b   :  { %v48_v28 = vmul.f32 %v128_v27, %v38_v26 }
  0x3d   :  { %v49_v29 = vsel %vm18_vm0, %v48_v28, 0.0 }
  0x3e   :  { %v50_v30 = vrot.slane %v49_v29, 4 }
  0x40   :  { %v51_v31 = vadd.f32 %v50_v30, %v49_v29 }
  0x42   :  { %v52_v32 = vrot.slane %v51_v31, 2 }
  0x44   :  { %v53_v33 = vadd.f32 %v52_v32, %v51_v31 }
  0x46   :  { %v54_v34 = vrot.slane %v53_v33, 1 }
  0x48   :  { %v55_v35 = vadd.f32 %v54_v34, %v53_v33 }
  0x4a   :  { %v69_v36 = vmul.f32 1.442695, %v55_v35 }
  0x4c   :  { %139 = vpow2.f32 %v69_v36 }
  0x56   :  { %v140_v38 = vpop.eup %139 }
  0x57   :  { %v71_v42 = vsub.f32 1.0, %v140_v38 }
  0x59   :  { %v72_v45 = vmax.f32 %v71_v42, 0.0 }
  0x5b   :  { %v73_v48 = vmul.f32 %v72_v45, %v72_v45 }
  0x81   :  { %v59_v37 = vpop.permute.xlu0 %58 }
  0x82   :  { %v61_v39 = vmul.f32 %v128_v27, %v59_v37 }
  0x84   :  { %v62_v40 = vsel %vm18_vm0, %v61_v39, 0.0 }
  0x85   :  { %v63_v41 = vrot.slane %v62_v40, 4 }
  0x87   :  { %v64_v43 = vadd.f32 %v63_v41, %v62_v40 }
  0x89   :  { %v65_v44 = vrot.slane %v64_v43, 2 }
  0x8b   :  { %v66_v46 = vadd.f32 %v65_v44, %v64_v43 }
  0x8d   :  { %v67_v47 = vrot.slane %v66_v46, 1 }
  0x8f   :  { %v68_v49 = vadd.f32 %v67_v47, %v66_v46 }
  0x91   :  { %v74_v51 = vmul.f32 %v73_v48, %v68_v49 }
  0x93   :  { %v75_v52 = vsub.f32 0.0, %v74_v51 }
  0x95   :  { %v76_v53 = vmul.f32 %v75_v52, %v55_v35 }
  0x97   :  { %v83_v54 = vsel %vm82_vm3, %v76_v53, 0.0 }
  0x98   :  { %v85_v55 = vsel %vm84_vm4, %v83_v54, 0.0 }
  0x99   :  { %86 = vadd.xlane.f32.xlu0 %v85_v55 }
 0x126   :  { %v87_v56 = vpop.xlane.xlu0 %86 }
 0x127   :  { %v88_v57 = vrot.slane %v87_v56, 4 }
 0x129   :  { %v89_v58 = vadd.f32 %v88_v57, %v87_v56 }
 0x12b   :  { %v90_v59 = vrot.slane %v89_v58, 2 }
 0x12d   :  { %v91_v60 = vadd.f32 %v90_v59, %v89_v58 }
 0x12f   :  { %v92_v61 = vrot.slane %v91_v60, 1 }
 0x131   :  { %v93_v62 = vadd.f32 %v92_v61, %v91_v60 }
 0x133   :  { %129 = vpush %v93_v62 }
 0x164   :  { %s130_s1 = spop %129 }
 0x165   :  { %v102_v0 = vstv %s130_s1 }
 0x166   :  { %v103_v1 = vadd.f32 %v102_v0, %v101_v63 }
 0x168   :  { %105 = vst.msk [vmem:[#allocation2] sm:$0x1] %vm99_vm1, %v103_v1 }
 0x16f   :  { %v109_v2 = vld [vmem:[#allocation2] sm:$0x1] }
 0x170   :  { %v111_v3 = vmul.f32 0.125, %v109_v2 }
 0x172   :  { %112 = vst.msk [vmem:[#allocation2] sm:$0x1] %vm99_vm1, %v111_v3 }
 0x173   :  { %152 = shalt.err (!%p149_p4)
}
 0x174   :  { %s153_s22 = scalar_lea.hbm %s219_s3, 16 }
 0x175   :  { %p154_p5 = scmp.ne.s32.totalorder %s219_s3, %s153_s22  ;;  %p157_p6 = scmp.lt.u32.totalorder %s153_s22, %s219_s3 }
 0x177   :  { %p159_p7 = pnand %p157_p6, %p154_p5 }
 0x179   :  { %162 = shalt.err (!%p159_p7)
}
 0x17a   :  { %122 = dma.vmem_to_hbm [thread:$0]  %s120_s17, 16, %s219_s3, [#allocation3]  }
 0x17b   :  { %163 = dma.done.wait [#allocation3], 16  }
 0x17c   :  { %164 = vsyncadd [#allocation3], 4294967280 }
 0x17d   :  { %126 = vsyncpa [#allocation3], 1 }

</bundles_post_ra>
